<compile_context>
chip_gen: v6e
topology: v6e:2x2x1
jax: 0.10.0
libtpu: 0.0.40
codegen_flags: <defaults>
</compile_context>

<pallas_src>
import jax
import jax.numpy as jnp
from jax import lax
from jax.experimental import pallas as pl
from jax.experimental.pallas import tpu as pltpu

EPS = 1e-08


def _cln_kernel(y_ref, gamma_ref, beta_ref, o_ref):
    # y_ref/o_ref: (TR, N) ; gamma_ref/beta_ref: (1, N), f32.
    y = y_ref[...].astype(jnp.float32)                       # (TR, N)
    inv_n = jnp.float32(1.0 / y.shape[-1])

    # Two-pass moments: exact match to the reference (mean, then centered var).
    mean = jnp.sum(y, axis=-1, keepdims=True) * inv_n        # (TR, 1)
    d = y - mean
    var = jnp.sum(d * d, axis=-1, keepdims=True) * inv_n     # (TR, 1)
    xhat = d * lax.rsqrt(var + EPS)                          # EUP rsqrt (free slot)

    out_dtype = o_ref.dtype
    if jnp.dtype(out_dtype) == jnp.float32:
        o_ref[...] = gamma_ref[...] * xhat + beta_ref[...]
    else:
        # Low-precision epilogue: bf16/f16 vregs hold 2x elements -> fewer
        # VALU slots / less vreg pressure on v6e & v7x.
        o_ref[...] = (gamma_ref[...].astype(out_dtype) * xhat.astype(out_dtype)
                      + beta_ref[...].astype(out_dtype))


def _vmem_capacity_bytes():
    try:
        return int(pltpu.get_tpu_info().vmem_capacity_bytes)
    except Exception:
        return 64 * 1024 * 1024          # conservative (v7x-sized) fallback


def _pick_tiling(R, N, io_itemsize):
    """Row-tile size and VMEM limit, scaled per TPU generation."""
    vmem = _vmem_capacity_bytes()
    if vmem >= 100 * 1024 * 1024:        # v5e / v6e: 128 MiB physical VMEM
        target_bytes = 8 * 1024 * 1024
        vmem_limit = 96 * 1024 * 1024
    else:                                # v7x: 64 MiB physical VMEM per TC
        target_bytes = 4 * 1024 * 1024
        vmem_limit = 48 * 1024 * 1024

    # Sublane multiple for the I/O dtype (8 for f32, 16 for bf16, 32 for int8).
    mult = max(8, 32 // max(int(io_itemsize), 1))
    # Size on the f32 intermediate footprint (kernel upcasts to f32).
    eff_itemsize = max(int(io_itemsize), 4)

    tr = target_bytes // (N * eff_itemsize)
    tr = max((tr // mult) * mult, mult)
    if tr >= R:
        tr = R                           # full-extent block is always legal
    return int(tr), int(vmem_limit)


def channelwise_layer_norm(y, gamma, beta):
    """cLN forward: y [M, K, N], gamma/beta [1, 1, N] -> [M, K, N] (dtype of y)."""
    M, K, N = y.shape
    R = M * K
    io_itemsize = jnp.dtype(y.dtype).itemsize

    # Contiguous row-major reshape: no HBM copy.
    y2 = y.reshape(R, N)
    gamma2 = gamma.reshape(1, N).astype(jnp.float32)
    beta2 = beta.reshape(1, N).astype(jnp.float32)

    tr, vmem_limit = _pick_tiling(R, N, io_itemsize)
    grid = (pl.cdiv(R, tr),)

    cost = pl.CostEstimate(
        flops=8 * R * N,
        transcendentals=R,
        bytes_accessed=2 * R * N * io_itemsize + 2 * N * 4,
    )

    out = pl.pallas_call(
        _cln_kernel,
        out_shape=jax.ShapeDtypeStruct((R, N), y.dtype),
        grid_spec=pltpu.PrefetchScalarGridSpec(
            num_scalar_prefetch=0,
            grid=grid,
            in_specs=[
                pl.BlockSpec((tr, N), lambda i: (i, 0)),     # y rows
                pl.BlockSpec((1, N), lambda i: (0, 0)),      # gamma (shared block)
                pl.BlockSpec((1, N), lambda i: (0, 0)),      # beta  (shared block)
            ],
            out_specs=pl.BlockSpec((tr, N), lambda i: (i, 0)),
        ),
        compiler_params=pltpu.CompilerParams(
            dimension_semantics=("parallel",),               # megacore-shardable
            vmem_limit_bytes=vmem_limit,
        ),
        cost_estimate=cost,
    )(y2, gamma2, beta2)

    return out.reshape(M, K, N)


def channelwise_layer_norm_ref(y, gamma, beta):
    """Pure-JAX reference mirroring the PyTorch forward exactly."""
    t = y.dtype
    yf = y.astype(jnp.float32)
    mean = jnp.mean(yf, axis=2, keepdims=True)
    var = jnp.mean((yf - mean) ** 2, axis=2, keepdims=True)   # unbiased=False
    out = gamma.astype(jnp.float32) * (yf - mean) / jnp.sqrt(var + EPS) \
        + beta.astype(jnp.float32)
    return out.astype(t)


if __name__ == "__main__":
    key = jax.random.PRNGKey(0)

    # Case 1: lane-dense channels (N multiple of 128).
    M, K, N = 2, 64, 128
    y = jax.random.normal(key, (M, K, N), dtype=jnp.float32)
    gamma = jnp.ones((1, 1, N), dtype=jnp.float32)    # reset_parameters(): gamma=1
    beta = jnp.zeros((1, 1, N), dtype=jnp.float32)    # reset_parameters(): beta=0
    out = jax.block_until_ready(channelwise_layer_norm(y, gamma, beta))
    ref = channelwise_layer_norm_ref(y, gamma, beta)
    assert out.shape == y.shape and out.dtype == y.dtype
    assert jnp.allclose(out, ref, atol=1e-5, rtol=1e-5), "mismatch (N=128)"

    # Case 2: N not a multiple of 128 — no wrapper padding, masked stores only.
    M2, K2, N2 = 2, 8, 32
    y2 = jax.random.normal(jax.random.PRNGKey(1), (M2, K2, N2), dtype=jnp.float32)
    gamma2 = jnp.ones((1, 1, N2), dtype=jnp.float32)
    beta2 = jnp.zeros((1, 1, N2), dtype=jnp.float32)
    out2 = jax.block_until_ready(channelwise_layer_norm(y2, gamma2, beta2))
    ref2 = channelwise_layer_norm_ref(y2, gamma2, beta2)
    assert out2.shape == y2.shape and out2.dtype == y2.dtype
    assert jnp.allclose(out2, ref2, atol=1e-5, rtol=1e-5), "mismatch (N=32)"

    # Case 3: bf16 I/O (exercises the low-precision epilogue path).
    M3, K3, N3 = 2, 16, 192
    y3 = jax.random.normal(jax.random.PRNGKey(2), (M3, K3, N3), dtype=jnp.bfloat16)
    gamma3 = jnp.ones((1, 1, N3), dtype=jnp.float32)
    beta3 = jnp.zeros((1, 1, N3), dtype=jnp.float32)
    out3 = jax.block_until_ready(channelwise_layer_norm(y3, gamma3, beta3))
    ref3 = channelwise_layer_norm_ref(y3, gamma3, beta3)
    assert out3.shape == y3.shape and out3.dtype == y3.dtype
    diff = jnp.max(jnp.abs(out3.astype(jnp.float32) - ref3.astype(jnp.float32)))
    assert diff < 5e-2, f"mismatch (bf16): {diff}"

    print("KERNEL_OK")
</pallas_src>

<mosaic_0001>
module attributes {stable_mosaic.version = 11 : i64} {
  func.func @_cln_kernel(%arg0: i32, %arg1: memref<128x128xf32, #tpu.memory_space<vmem>>, %arg2: memref<1x128xf32, #tpu.memory_space<vmem>>, %arg3: memref<1x128xf32, #tpu.memory_space<vmem>>, %arg4: memref<128x128xf32, #tpu.memory_space<vmem>>) attributes {dimension_semantics = [#tpu.dimension_semantics<parallel>], iteration_bounds = array<i64: 1>, scalar_prefetch = 0 : i64, scratch_operands = 0 : i64, tpu.core_type = #tpu.core_type<tc>, window_params = [{transform_indices = @transform_0, window_bounds = array<i64: 128, 128>}, {pipeline_mode = #tpu.pipeline_mode<synchronous>, transform_indices = @transform_1, window_bounds = array<i64: 1, 128>}, {pipeline_mode = #tpu.pipeline_mode<synchronous>, transform_indices = @transform_2, window_bounds = array<i64: 1, 128>}, {transform_indices = @transform_3, window_bounds = array<i64: 128, 128>}]} {
    %c0 = arith.constant 0 : index
    %c0_0 = arith.constant 0 : index
    %0 = vector.load %arg1[%c0, %c0_0] : memref<128x128xf32, #tpu.memory_space<vmem>>, vector<128x128xf32>
    %cst = arith.constant dense<0.000000e+00> : vector<128xf32>
    %1 = vector.multi_reduction <add>, %0, %cst [1] : vector<128x128xf32> to vector<128xf32>
    %2 = vector.shape_cast %1 : vector<128xf32> to vector<128x1xf32>
    %cst_1 = arith.constant 7.812500e-03 : f32
    %3 = vector.broadcast %cst_1 : f32 to vector<128x1xf32>
    %4 = arith.mulf %2, %3 : vector<128x1xf32>
    %5 = vector.broadcast %4 : vector<128x1xf32> to vector<128x128xf32>
    %6 = arith.subf %0, %5 : vector<128x128xf32>
    %7 = arith.mulf %6, %6 : vector<128x128xf32>
    %cst_2 = arith.constant dense<0.000000e+00> : vector<128xf32>
    %8 = vector.multi_reduction <add>, %7, %cst_2 [1] : vector<128x128xf32> to vector<128xf32>
    %9 = vector.shape_cast %8 : vector<128xf32> to vector<128x1xf32>
    %cst_3 = arith.constant 7.812500e-03 : f32
    %10 = vector.broadcast %cst_3 : f32 to vector<128x1xf32>
    %11 = arith.mulf %9, %10 : vector<128x1xf32>
    %cst_4 = arith.constant 9.99999993E-9 : f32
    %12 = vector.broadcast %cst_4 : f32 to vector<128x1xf32>
    %13 = arith.addf %11, %12 : vector<128x1xf32>
    %14 = math.rsqrt %13 : vector<128x1xf32>
    %15 = vector.broadcast %14 : vector<128x1xf32> to vector<128x128xf32>
    %16 = arith.mulf %6, %15 : vector<128x128xf32>
    %c0_5 = arith.constant 0 : index
    %c0_6 = arith.constant 0 : index
    %17 = vector.load %arg2[%c0_5, %c0_6] : memref<1x128xf32, #tpu.memory_space<vmem>>, vector<1x128xf32>
    %18 = vector.broadcast %17 : vector<1x128xf32> to vector<128x128xf32>
    %19 = arith.mulf %18, %16 : vector<128x128xf32>
    %c0_7 = arith.constant 0 : index
    %c0_8 = arith.constant 0 : index
    %20 = vector.load %arg3[%c0_7, %c0_8] : memref<1x128xf32, #tpu.memory_space<vmem>>, vector<1x128xf32>
    %21 = vector.broadcast %20 : vector<1x128xf32> to vector<128x128xf32>
    %22 = arith.addf %19, %21 : vector<128x128xf32>
    %c0_9 = arith.constant 0 : index
    %c0_10 = arith.constant 0 : index
    %23 = vector.load %arg4[%c0_9, %c0_10] : memref<128x128xf32, #tpu.memory_space<vmem>>, vector<128x128xf32>
    tpu.vector_store %arg4[%c0_9, %c0_10], %22 {strides = array<i32>} : memref<128x128xf32, #tpu.memory_space<vmem>>, vector<128x128xf32>,
    return
  }
  func.func @transform_0(%arg0: i32) -> (i32, i32) {
    %c0_i32 = arith.constant 0 : i32
    %c0_i32_0 = arith.constant 0 : i32
    return %arg0, %c0_i32 : i32, i32
  }
  func.func @transform_1(%arg0: i32) -> (i32, i32) {
    %c0_i32 = arith.constant 0 : i32
    %c0_i32_0 = arith.constant 0 : i32
    %c0_i32_1 = arith.constant 0 : i32
    return %c0_i32, %c0_i32_0 : i32, i32
  }
  func.func @transform_2(%arg0: i32) -> (i32, i32) {
    %c0_i32 = arith.constant 0 : i32
    %c0_i32_0 = arith.constant 0 : i32
    %c0_i32_1 = arith.constant 0 : i32
    return %c0_i32, %c0_i32_0 : i32, i32
  }
  func.func @transform_3(%arg0: i32) -> (i32, i32) {
    %c0_i32 = arith.constant 0 : i32
    %c0_i32_0 = arith.constant 0 : i32
    return %arg0, %c0_i32 : i32, i32
  }
}

</mosaic_0001>

<bundles_post_ra>
// kernel: tpu_custom_call.1
= control target key start
LH: loop header
LB: loop body
LE: loop exit
PB: predicated region body
PF: predicated region fallthrough
CT: control target
= control target key end

     0   :  { %8 = vsyncpa [#allocation3], 0  ;;  %s560_s0 = inlined_call_operand.hbm [shape: f32[128,128], index: 0, kind: input, shape index: {}]   ;;  %s561_s1 = inlined_call_operand.vmem [shape: f32[1,128], index: 1, kind: input, shape index: {}]   ;;  %s562_s2 = inlined_call_operand.vmem [shape: f32[1,128], index: 2, kind: input, shape index: {}]   ;;  %s563_s3 = inlined_call_operand.hbm [shape: f32[128,128], index: 3, kind: output, shape index: {}]  }
   0x1   :  { %9 = vsyncpa [#allocation4], 0  ;;  %s382_s12 = smov [#allocation2]  }
   0x2   :  { %s15_s13 = sshll.u32 %s382_s12, 4  ;;  %s16_s13 = int_to_ptr.vmem [resolvable:$true] %s15_s13 }
   0x3   :  { %s346_s14 = scalar_lea.vmem %s16_s13, 2048  ;;  %p351_p1 = scmp.lt.s32.totalorder %s16_s13, %s16_s13 }
   0x4   :  { %p347_p0 = scmp.ne.s32.totalorder %s16_s13, %s346_s14  ;;  %p352_p2 = scmp.lt.s32.totalorder %s346_s14, %s346_s14 }
   0x6   :  { %p353_p3 = por %p352_p2, %p351_p1 }
   0x8   :  { %p354_p4 = pnand %p353_p3, %p347_p0 }
   0xa   :  { %357 = shalt.err (!%p354_p4)
}
   0xb   :  { %s383_s15 = smov 128   ;;  %s384_s16 = smov 8  }
   0xc   :  { %21 = dma.hbm_to_vmem [thread:$0]  %s560_s0, 2048, %s16_s13, [#allocation3], %s383_s15, %s383_s15, %s384_s16  }
   0xd   :  { %378 = dma.done.wait [#allocation3], 2048  }
   0xe   :  { %379 = vsyncadd [#allocation3], 4294965248  ;;  %v29_v0 = vld [vmem:[#allocation2] sm:$0xff]  ;;  %v31_v1 = vld [vmem:[#allocation2 + $0x10] sm:$0xff] }
   0xf   :  { %45 = vadd.xlane.f32.xlu0 %v29_v0  ;;  %49 = vadd.xlane.f32.xlu1 %v31_v1  ;;  %v30_v2 = vld [vmem:[#allocation2 + $0x8] sm:$0xff]  ;;  %v32_v3 = vld [vmem:[#allocation2 + $0x18] sm:$0xff]  ;;  %v33_v4 = vld [vmem:[#allocation2 + $0x20] sm:$0xff] }
  0x10   :  { %v34_v5 = vld [vmem:[#allocation2 + $0x28] sm:$0xff]  ;;  %v35_v6 = vld [vmem:[#allocation2 + $0x30] sm:$0xff]  ;;  %v36_v7 = vld [vmem:[#allocation2 + $0x38] sm:$0xff] }
  0x11   :  { %v37_v8 = vld [vmem:[#allocation2 + $0x40] sm:$0xff]  ;;  %v38_v9 = vld [vmem:[#allocation2 + $0x48] sm:$0xff]  ;;  %v39_v10 = vld [vmem:[#allocation2 + $0x50] sm:$0xff] }
  0x12   :  { %v412_v11 = vld [vmem:[#allocation2 + $0x58] sm:$0xff]  ;;  %v415_v12 = vld [vmem:[#allocation2 + $0x60] sm:$0xff]  ;;  %v417_v13 = vld [vmem:[#allocation2 + $0x68] sm:$0xff] }
  0x13   :  { %47 = vadd.xlane.f32.xlu0 %v30_v2  ;;  %51 = vadd.xlane.f32.xlu1 %v32_v3  ;;  %v421_v14 = vld [vmem:[#allocation2 + $0x70] sm:$0xff]  ;;  %v423_v15 = vld [vmem:[#allocation2 + $0x78] sm:$0xff] }
  0x17   :  { %53 = vadd.xlane.f32.xlu0 %v33_v4  ;;  %55 = vadd.xlane.f32.xlu1 %v34_v5 }
  0x1b   :  { %57 = vadd.xlane.f32.xlu0 %v35_v6  ;;  %59 = vadd.xlane.f32.xlu1 %v36_v7 }
  0x1f   :  { %61 = vadd.xlane.f32.xlu0 %v37_v8  ;;  %63 = vadd.xlane.f32.xlu1 %v38_v9 }
  0x23   :  { %65 = vadd.xlane.f32.xlu0 %v39_v10  ;;  %67 = vadd.xlane.f32.xlu1 %v412_v11 }
  0x27   :  { %69 = vadd.xlane.f32.xlu0 %v415_v12  ;;  %71 = vadd.xlane.f32.xlu1 %v417_v13 }
  0x2b   :  { %73 = vadd.xlane.f32.xlu0 %v421_v14  ;;  %75 = vadd.xlane.f32.xlu1 %v423_v15 }
  0x98   :  { %v46_v16 = vpop.xlane.xlu0 %45  ;;  %v50_v17 = vpop.xlane.xlu1 %49 }
  0x99   :  { %v77_v18 = vmul.f32 0.0078125, %v46_v16  ;;  %v79_v19 = vmul.f32 0.0078125, %v50_v17 }
  0x9b   :  { %v427_v20 = vsub.f32 %v29_v0, %v77_v18  ;;  %v429_v21 = vsub.f32 %v31_v1, %v79_v19 }
  0x9c   :  { %v48_v22 = vpop.xlane.xlu0 %47  ;;  %v52_v23 = vpop.xlane.xlu1 %51 }
  0x9d   :  { %v78_v24 = vmul.f32 0.0078125, %v48_v22  ;;  %v109_v25 = vmul.f32 %v427_v20, %v427_v20  ;;  %v80_v26 = vmul.f32 0.0078125, %v52_v23  ;;  %v111_v29 = vmul.f32 %v429_v21, %v429_v21 }
  0x9f   :  { %v433_v27 = vsub.f32 %v30_v2, %v78_v24  ;;  %125 = vadd.xlane.f32.xlu0 %v109_v25  ;;  %v435_v28 = vsub.f32 %v32_v3, %v80_v26 }
  0xa0   :  { %v54_v30 = vpop.xlane.xlu0 %53  ;;  %v56_v31 = vpop.xlane.xlu1 %55 }
  0xa1   :  { %v81_v32 = vmul.f32 0.0078125, %v54_v30  ;;  %v110_v33 = vmul.f32 %v433_v27, %v433_v27  ;;  %v82_v34 = vmul.f32 0.0078125, %v56_v31  ;;  %v112_v37 = vmul.f32 %v435_v28, %v435_v28 }
  0xa3   :  { %v441_v35 = vsub.f32 %v33_v4, %v81_v32  ;;  %129 = vadd.xlane.f32.xlu0 %v111_v29  ;;  %127 = vadd.xlane.f32.xlu1 %v110_v33  ;;  %v443_v36 = vsub.f32 %v34_v5, %v82_v34 }
  0xa4   :  { %v58_v38 = vpop.xlane.xlu0 %57  ;;  %v60_v39 = vpop.xlane.xlu1 %59 }
  0xa5   :  { %v83_v40 = vmul.f32 0.0078125, %v58_v38  ;;  %v113_v41 = vmul.f32 %v441_v35, %v441_v35  ;;  %v84_v42 = vmul.f32 0.0078125, %v60_v39  ;;  %v114_v45 = vmul.f32 %v443_v36, %v443_v36 }
  0xa7   :  { %v449_v43 = vsub.f32 %v35_v6, %v83_v40  ;;  %131 = vadd.xlane.f32.xlu1 %v112_v37  ;;  %133 = vadd.xlane.f32.xlu0 %v113_v41  ;;  %v451_v44 = vsub.f32 %v36_v7, %v84_v42 }
  0xa8   :  { %v62_v46 = vpop.xlane.xlu0 %61  ;;  %v64_v47 = vpop.xlane.xlu1 %63 }
  0xa9   :  { %v85_v48 = vmul.f32 0.0078125, %v62_v46  ;;  %v115_v49 = vmul.f32 %v449_v43, %v449_v43  ;;  %v86_v50 = vmul.f32 0.0078125, %v64_v47  ;;  %v116_v53 = vmul.f32 %v451_v44, %v451_v44 }
  0xab   :  { %v457_v51 = vsub.f32 %v37_v8, %v85_v48  ;;  %135 = vadd.xlane.f32.xlu1 %v114_v45  ;;  %137 = vadd.xlane.f32.xlu0 %v115_v49  ;;  %v459_v52 = vsub.f32 %v38_v9, %v86_v50  ;;  %v499_v50 = vld [vmem:[%s561_s1] ss:$0 sm:$0xff]  ;;  %s385_s1 = smov [#allocation5]  }
  0xac   :  { %v66_v54 = vpop.xlane.xlu0 %65  ;;  %v68_v55 = vpop.xlane.xlu1 %67 }
  0xad   :  { %v87_v56 = vmul.f32 0.0078125, %v66_v54  ;;  %v117_v57 = vmul.f32 %v457_v51, %v457_v51  ;;  %v88_v58 = vmul.f32 0.0078125, %v68_v55  ;;  %v118_v61 = vmul.f32 %v459_v52, %v459_v52 }
  0xaf   :  { %v465_v59 = vsub.f32 %v39_v10, %v87_v56  ;;  %139 = vadd.xlane.f32.xlu1 %v116_v53  ;;  %141 = vadd.xlane.f32.xlu0 %v117_v57  ;;  %v468_v60 = vsub.f32 %v412_v11, %v88_v58  ;;  %v505_v56 = vld [vmem:[%s562_s2] ss:$0 sm:$0xff]  ;;  %s288_s2 = sshll.u32 %s385_s1, 4  ;;  %s289_s2 = int_to_ptr.vmem [resolvable:$true] %s288_s2 }
  0xb0   :  { %v70_v62 = vpop.xlane.xlu0 %69  ;;  %v72_v63 = vpop.xlane.xlu1 %71  ;;  %s358_s22 = scalar_lea.vmem %s289_s2, 2048  ;;  %p363_p6 = scmp.lt.s32.totalorder %s289_s2, %s289_s2 }
  0xb1   :  { %v89_v0 = vmul.f32 0.0078125, %v70_v62  ;;  %v119_v1 = vmul.f32 %v465_v59, %v465_v59  ;;  %v90_v2 = vmul.f32 0.0078125, %v72_v63  ;;  %v120_v5 = vmul.f32 %v468_v60, %v468_v60  ;;  %p359_p5 = scmp.ne.s32.totalorder %s289_s2, %s358_s22  ;;  %p364_p7 = scmp.lt.s32.totalorder %s358_s22, %s358_s22 }
  0xb3   :  { %v475_v3 = vsub.f32 %v415_v12, %v89_v0  ;;  %143 = vadd.xlane.f32.xlu1 %v118_v61  ;;  %145 = vadd.xlane.f32.xlu0 %v119_v1  ;;  %v478_v4 = vsub.f32 %v417_v13, %v90_v2  ;;  %p365_p8 = por %p364_p7, %p363_p6 }
  0xb4   :  { %v74_v6 = vpop.xlane.xlu0 %73  ;;  %v76_v7 = vpop.xlane.xlu1 %75 }
  0xb5   :  { %v91_v8 = vmul.f32 0.0078125, %v74_v6  ;;  %v121_v9 = vmul.f32 %v475_v3, %v475_v3  ;;  %v92_v10 = vmul.f32 0.0078125, %v76_v7  ;;  %v122_v13 = vmul.f32 %v478_v4, %v478_v4  ;;  %p366_p9 = pnand %p365_p8, %p359_p5 }
  0xb7   :  { %v485_v11 = vsub.f32 %v421_v14, %v91_v8  ;;  %147 = vadd.xlane.f32.xlu1 %v120_v5  ;;  %149 = vadd.xlane.f32.xlu0 %v121_v9  ;;  %v488_v12 = vsub.f32 %v423_v15, %v92_v10 }
  0xb9   :  { %v123_v16 = vmul.f32 %v485_v11, %v485_v11  ;;  %v124_v17 = vmul.f32 %v488_v12, %v488_v12 }
  0xbb   :  { %151 = vadd.xlane.f32.xlu1 %v122_v13  ;;  %153 = vadd.xlane.f32.xlu0 %v123_v16 }
  0xbf   :  { %155 = vadd.xlane.f32.xlu1 %v124_v17 }
 0x128   :  { %v126_v18 = vpop.xlane.xlu0 %125 }
 0x129   :  { %v157_v14 = vmul.f32 0.0078125, %v126_v18 }
 0x12b   :  { %v173_v19 = vadd.f32 1e-08, %v157_v14 }
 0x12c   :  { %v128_v22 = vpop.xlane.xlu1 %127  ;;  %v130_v23 = vpop.xlane.xlu0 %129 }
 0x12d   :  { %306 = vrsqrt.f32 %v173_v19  ;;  %v158_v15 = vmul.f32 0.0078125, %v128_v22  ;;  %v159_v24 = vmul.f32 0.0078125, %v130_v23 }
 0x12f   :  { %v174_v25 = vadd.f32 1e-08, %v158_v15  ;;  %v175_v26 = vadd.f32 1e-08, %v159_v24 }
 0x130   :  { %v132_v29 = vpop.xlane.xlu1 %131  ;;  %v134_v30 = vpop.xlane.xlu0 %133 }
 0x131   :  { %308 = vrsqrt.f32 %v174_v25  ;;  %v160_v31 = vmul.f32 0.0078125, %v132_v29  ;;  %v161_v32 = vmul.f32 0.0078125, %v134_v30 }
 0x132   :  { %310 = vrsqrt.f32 %v175_v26 }
 0x133   :  { %v176_v33 = vadd.f32 1e-08, %v160_v31  ;;  %v177_v34 = vadd.f32 1e-08, %v161_v32 }
 0x134   :  { %v136_v37 = vpop.xlane.xlu1 %135  ;;  %v138_v38 = vpop.xlane.xlu0 %137 }
 0x135   :  { %312 = vrsqrt.f32 %v176_v33  ;;  %v162_v39 = vmul.f32 0.0078125, %v136_v37  ;;  %v163_v40 = vmul.f32 0.0078125, %v138_v38 }
 0x136   :  { %314 = vrsqrt.f32 %v177_v34 }
 0x137   :  { %v178_v41 = vadd.f32 1e-08, %v162_v39  ;;  %v179_v42 = vadd.f32 1e-08, %v163_v40 }
 0x138   :  { %v140_v45 = vpop.xlane.xlu1 %139  ;;  %v142_v46 = vpop.xlane.xlu0 %141 }
 0x139   :  { %316 = vrsqrt.f32 %v178_v41  ;;  %v164_v47 = vmul.f32 0.0078125, %v140_v45  ;;  %v165_v48 = vmul.f32 0.0078125, %v142_v46 }
 0x13a   :  { %v307_v49 = vpop.eup %306  ;;  %318 = vrsqrt.f32 %v179_v42 }
 0x13b   :  { %v205_v53 = vmul.f32 %v307_v49, %v427_v20  ;;  %v180_v54 = vadd.f32 1e-08, %v164_v47  ;;  %v181_v55 = vadd.f32 1e-08, %v165_v48 }
 0x13c   :  { %v144_v57 = vpop.xlane.xlu1 %143  ;;  %v146_v58 = vpop.xlane.xlu0 %145 }
 0x13d   :  { %v228_v61 = vmul.f32 %v499_v50, %v205_v53  ;;  %320 = vrsqrt.f32 %v180_v54  ;;  %v166_v62 = vmul.f32 0.0078125, %v144_v57  ;;  %v167_v63 = vmul.f32 0.0078125, %v146_v58 }
 0x13e   :  { %v309_v0 = vpop.eup %308  ;;  %322 = vrsqrt.f32 %v181_v55 }
 0x13f   :  { %v311_v1 = vpop.eup %310  ;;  %v251_v2 = vadd.f32 %v505_v56, %v228_v61  ;;  %v206_v20 = vmul.f32 %v309_v0, %v433_v27  ;;  %v182_v5 = vadd.f32 1e-08, %v166_v62  ;;  %v183_v6 = vadd.f32 1e-08, %v167_v63 }
 0x140   :  { %v207_v7 = vmul.f32 %v311_v1, %v429_v21  ;;  %v148_v8 = vpop.xlane.xlu1 %147  ;;  %v150_v9 = vpop.xlane.xlu0 %149 }
 0x141   :  { %267 = vst [vmem:[#allocation5] sm:$0xff] %v251_v2  ;;  %v229_v10 = vmul.f32 %v499_v50, %v206_v20  ;;  %324 = vrsqrt.f32 %v182_v5  ;;  %v168_v13 = vmul.f32 0.0078125, %v148_v8  ;;  %v169_v16 = vmul.f32 0.0078125, %v150_v9 }
 0x142   :  { %v313_v17 = vpop.eup %312  ;;  %v230_v18 = vmul.f32 %v499_v50, %v207_v7  ;;  %326 = vrsqrt.f32 %v183_v6 }
 0x143   :  { %v315_v14 = vpop.eup %314  ;;  %v252_v19 = vadd.f32 %v505_v56, %v229_v10  ;;  %v208_v27 = vmul.f32 %v313_v17, %v435_v28  ;;  %v184_v22 = vadd.f32 1e-08, %v168_v13  ;;  %v185_v23 = vadd.f32 1e-08, %v169_v16 }
 0x144   :  { %v253_v21 = vadd.f32 %v505_v56, %v230_v18  ;;  %v209_v15 = vmul.f32 %v315_v14, %v441_v35  ;;  %v152_v24 = vpop.xlane.xlu1 %151  ;;  %v154_v25 = vpop.xlane.xlu0 %153 }
 0x145   :  { %268 = vst [vmem:[#allocation5 + $0x8] sm:$0xff] %v252_v19  ;;  %v231_v26 = vmul.f32 %v499_v50, %v208_v27  ;;  %328 = vrsqrt.f32 %v184_v22  ;;  %v170_v29 = vmul.f32 0.0078125, %v152_v24  ;;  %v171_v30 = vmul.f32 0.0078125, %v154_v25 }
 0x146   :  { %v317_v31 = vpop.eup %316  ;;  %269 = vst [vmem:[#allocation5 + $0x10] sm:$0xff] %v253_v21  ;;  %v232_v32 = vmul.f32 %v499_v50, %v209_v15  ;;  %330 = vrsqrt.f32 %v185_v23 }
 0x147   :  { %v319_v28 = vpop.eup %318  ;;  %v254_v33 = vadd.f32 %v505_v56, %v231_v26  ;;  %v210_v34 = vmul.f32 %v317_v31, %v443_v36  ;;  %v186_v37 = vadd.f32 1e-08, %v170_v29  ;;  %v187_v35 = vadd.f32 1e-08, %v171_v30 }
 0x148   :  { %v255_v38 = vadd.f32 %v505_v56, %v232_v32  ;;  %v211_v39 = vmul.f32 %v319_v28, %v449_v43  ;;  %v156_v40 = vpop.xlane.xlu1 %155 }
 0x149   :  { %270 = vst [vmem:[#allocation5 + $0x18] sm:$0xff] %v254_v33  ;;  %v233_v41 = vmul.f32 %v499_v50, %v210_v34  ;;  %332 = vrsqrt.f32 %v186_v37  ;;  %v172_v42 = vmul.f32 0.0078125, %v156_v40 }
 0x14a   :  { %v321_v45 = vpop.eup %320  ;;  %271 = vst [vmem:[#allocation5 + $0x20] sm:$0xff] %v255_v38  ;;  %v234_v46 = vmul.f32 %v499_v50, %v211_v39  ;;  %334 = vrsqrt.f32 %v187_v35 }
 0x14b   :  { %v323_v47 = vpop.eup %322  ;;  %v256_v36 = vadd.f32 %v505_v56, %v233_v41  ;;  %v212_v48 = vmul.f32 %v321_v45, %v451_v44  ;;  %v188_v49 = vadd.f32 1e-08, %v172_v42 }
 0x14c   :  { %v257_v53 = vadd.f32 %v505_v56, %v234_v46  ;;  %v213_v43 = vmul.f32 %v323_v47, %v457_v51 }
 0x14d   :  { %272 = vst [vmem:[#allocation5 + $0x28] sm:$0xff] %v256_v36  ;;  %v235_v54 = vmul.f32 %v499_v50, %v212_v48  ;;  %336 = vrsqrt.f32 %v188_v49 }
 0x14e   :  { %v325_v55 = vpop.eup %324  ;;  %273 = vst [vmem:[#allocation5 + $0x30] sm:$0xff] %v257_v53  ;;  %v236_v57 = vmul.f32 %v499_v50, %v213_v43 }
 0x14f   :  { %v327_v58 = vpop.eup %326  ;;  %v258_v61 = vadd.f32 %v505_v56, %v235_v54  ;;  %v214_v62 = vmul.f32 %v325_v55, %v459_v52 }
 0x150   :  { %v259_v44 = vadd.f32 %v505_v56, %v236_v57  ;;  %v215_v63 = vmul.f32 %v327_v58, %v465_v59 }
 0x151   :  { %274 = vst [vmem:[#allocation5 + $0x38] sm:$0xff] %v258_v61  ;;  %v237_v51 = vmul.f32 %v499_v50, %v214_v62 }
 0x152   :  { %v329_v0 = vpop.eup %328  ;;  %275 = vst [vmem:[#allocation5 + $0x40] sm:$0xff] %v259_v44  ;;  %v238_v1 = vmul.f32 %v499_v50, %v215_v63 }
 0x153   :  { %v331_v2 = vpop.eup %330  ;;  %v260_v20 = vadd.f32 %v505_v56, %v237_v51  ;;  %v216_v5 = vmul.f32 %v329_v0, %v468_v60 }
 0x154   :  { %v261_v6 = vadd.f32 %v505_v56, %v238_v1  ;;  %v217_v52 = vmul.f32 %v331_v2, %v475_v3 }
 0x155   :  { %276 = vst [vmem:[#allocation5 + $0x48] sm:$0xff] %v260_v20  ;;  %v239_v7 = vmul.f32 %v499_v50, %v216_v5 }
 0x156   :  { %v333_v59 = vpop.eup %332  ;;  %277 = vst [vmem:[#allocation5 + $0x50] sm:$0xff] %v261_v6  ;;  %v240_v8 = vmul.f32 %v499_v50, %v217_v52 }
 0x157   :  { %v335_v9 = vpop.eup %334  ;;  %v262_v10 = vadd.f32 %v505_v56, %v239_v7  ;;  %v218_v13 = vmul.f32 %v333_v59, %v478_v4 }
 0x158   :  { %v263_v16 = vadd.f32 %v505_v56, %v240_v8  ;;  %v219_v60 = vmul.f32 %v335_v9, %v485_v11 }
 0x159   :  { %278 = vst [vmem:[#allocation5 + $0x58] sm:$0xff] %v262_v10  ;;  %v241_v17 = vmul.f32 %v499_v50, %v218_v13 }
 0x15a   :  { %v337_v3 = vpop.eup %336  ;;  %279 = vst [vmem:[#allocation5 + $0x60] sm:$0xff] %v263_v16  ;;  %v242_v18 = vmul.f32 %v499_v50, %v219_v60 }
 0x15b   :  { %v264_v14 = vadd.f32 %v505_v56, %v241_v17  ;;  %v220_v19 = vmul.f32 %v337_v3, %v488_v12 }
 0x15c   :  { %v265_v27 = vadd.f32 %v505_v56, %v242_v18 }
 0x15d   :  { %280 = vst [vmem:[#allocation5 + $0x68] sm:$0xff] %v264_v14  ;;  %v243_v4 = vmul.f32 %v499_v50, %v220_v19 }
 0x15e   :  { %281 = vst [vmem:[#allocation5 + $0x70] sm:$0xff] %v265_v27 }
 0x15f   :  { %v266_v11 = vadd.f32 %v505_v56, %v243_v4 }
 0x161   :  { %282 = vst [vmem:[#allocation5 + $0x78] sm:$0xff] %v266_v11 }
 0x162   :  { %369 = shalt.err (!%p366_p9)
}
 0x163   :  { %294 = dma.vmem_to_hbm [thread:$0]  %s289_s2, 2048, %s563_s3, [#allocation4], %s383_s15, %s383_s15, %s384_s16  }
 0x164   :  { %380 = dma.done.wait [#allocation4], 2048  }
 0x165   :  { %381 = vsyncadd [#allocation4], 4294965248 }
 0x166   :  { %298 = vsyncpa [#allocation3], 1 }
 0x167   :  { %299 = vsyncpa [#allocation4], 1 }

</bundles_post_ra>
